<compile_context>
chip_gen: v5e
topology: v5e:2x2
jax: 0.10.0
libtpu: 0.0.40
codegen_flags: <defaults>
</compile_context>

<pallas_src>
import functools

import numpy as np
import jax
import jax.numpy as jnp
from jax.experimental import pallas as pl
from jax.experimental.pallas import tpu as pltpu


_STEM_CIN_PAD = 8  # pad the 3-channel network input to 8 so stem K = 49*8 (mult of 8)


def _round_up(x, m):
    return ((x + m - 1) // m) * m


# ----------------------------------------------------------------------------
# Pallas matmul kernel with fused BN / bias / residual / ReLU epilogue
# ----------------------------------------------------------------------------
def _mm_bn_act_kernel(*refs, relu, has_res, nk):
    """o = act((A @ B) * scale + shift [+ residual]); A,B bf16; acc f32."""
    if nk > 1:
        *in_refs, o_ref, acc_ref = refs
    else:
        *in_refs, o_ref = refs
        acc_ref = None
    if has_res:
        a_ref, b_ref, scale_ref, shift_ref, res_ref = in_refs
    else:
        a_ref, b_ref, scale_ref, shift_ref = in_refs
        res_ref = None

    prod = jnp.dot(a_ref[...], b_ref[...], preferred_element_type=jnp.float32)

    def _epilogue(acc):
        y = acc * scale_ref[...] + shift_ref[...]
        if has_res:
            y = y + res_ref[...].astype(jnp.float32)
        if relu:
            y = jnp.maximum(y, 0.0)
        o_ref[...] = y.astype(o_ref.dtype)

    if nk == 1:
        # Single K step (all 1x1 convs): no scratch round trip, no zero-init.
        _epilogue(prod)
    else:
        @pl.when(pl.program_id(2) == 0)
        def _():
            acc_ref[...] = prod                 # direct write, no zero + add

        @pl.when(pl.program_id(2) > 0)
        def _():
            acc_ref[...] += prod

        @pl.when(pl.program_id(2) == nk - 1)
        def _():
            _epilogue(acc_ref[...])


def _choose_tiles(M, Kp, Np):
    # M tiling
    if M <= 512:
        Mp = _round_up(M, 8)
        tm = Mp
    else:
        Mp = _round_up(M, 512)
        tm = 512
    # N tiling: largest of 512/256/128 dividing Np (halves A re-streaming)
    if Np % 512 == 0:
        tn = 512
    elif Np % 256 == 0:
        tn = 256
    else:
        tn = 128
    # K tiling
    if Kp % 128 == 0:
        tk = 128
        for cand in range(2048, 0, -128):
            if Kp % cand == 0:
                tk = cand
                break
    else:
        tk = Kp          # single full-K tile (K is a multiple of 8, <= 2048)
    # v7x megacore: make sure there are >= 2 parallel tiles so both TCs work.
    if (Mp // tm) * (Np // tn) == 1:
        if tn >= 256:
            tn //= 2
        elif tm >= 16 and Mp % 16 == 0:
            tm //= 2
    return Mp, tm, tn, tk


def _k_pad(K):
    if K % 128 == 0:
        return K
    if K % 8 == 0 and K <= 2048:
        return K         # legal as a single full-extent K block, no padding
    return _round_up(K, 128)


# ----------------------------------------------------------------------------
# Conv = im2col (fused XLA glue, bf16) + Pallas MXU matmul (hot path)
# ----------------------------------------------------------------------------
def _extract_patches(x, kh, kw, stride, padding, dilation):
    N, H, W, C = x.shape
    if kh == 1 and kw == 1 and padding == 0:
        xs = x if stride == 1 else x[:, ::stride, ::stride, :]
        Nn, Ho, Wo, _ = xs.shape
        return xs.reshape(Nn * Ho * Wo, C), (Nn, Ho, Wo)
    xp = jnp.pad(x, ((0, 0), (padding, padding), (padding, padding), (0, 0)))
    Ho = (H + 2 * padding - dilation * (kh - 1) - 1) // stride + 1
    Wo = (W + 2 * padding - dilation * (kw - 1) - 1) // stride + 1
    cols = []
    for i in range(kh):
        for j in range(kw):
            cols.append(
                xp[:, i * dilation:i * dilation + (Ho - 1) * stride + 1:stride,
                      j * dilation:j * dilation + (Wo - 1) * stride + 1:stride, :])
    patches = jnp.concatenate(cols, axis=-1)            # (N, Ho, Wo, kh*kw*C)
    return patches.reshape(N * Ho * Wo, kh * kw * C), (N, Ho, Wo)


@functools.partial(jax.jit, static_argnames=(
    "kh", "kw", "stride", "padding", "dilation", "relu", "out_dtype"))
def _conv_impl(x, w, scale, shift, residual, *, kh, kw, stride, padding,
               dilation, relu, out_dtype):
    x = x.astype(jnp.bfloat16)                          # bf16 MXU inputs
    patches, (Nn, Ho, Wo) = _extract_patches(x, kh, kw, stride, padding, dilation)
    M, K = patches.shape
    Kp, Np = w.shape
    assert Kp >= K
    Mp, tm, tn, tk = _choose_tiles(M, Kp, Np)

    if Mp != M or Kp != K:
        patches = jnp.pad(patches, ((0, Mp - M), (0, Kp - K)))

    args = [patches, w, scale, shift]
    in_specs = [pl.BlockSpec((tm, tk), lambda i, j, k: (i, k)),
                pl.BlockSpec((tk, tn), lambda i, j, k: (k, j)),
                pl.BlockSpec((1, tn), lambda i, j, k: (0, j)),
                pl.BlockSpec((1, tn), lambda i, j, k: (0, j))]
    has_res = residual is not None
    if has_res:
        r = residual.astype(jnp.bfloat16).reshape(M, -1)     # (M, Np)
        assert r.shape[1] == Np
        if Mp != M:
            r = jnp.pad(r, ((0, Mp - M), (0, 0)))
        args.append(r)
        in_specs.append(pl.BlockSpec((tm, tn), lambda i, j, k: (i, j)))

    nk = Kp // tk
    kernel = functools.partial(_mm_bn_act_kernel, relu=relu, has_res=has_res, nk=nk)
    scratch = [pltpu.VMEM((tm, tn), jnp.float32)] if nk > 1 else []
    out_bytes = jnp.dtype(out_dtype).itemsize
    cost = pl.CostEstimate(
        flops=2 * Mp * Kp * Np,
        transcendentals=0,
        bytes_accessed=(Mp * Kp * 2 + Kp * Np * 2 + Mp * Np * out_bytes
                        + (Mp * Np * 2 if has_res else 0)))

    out = pl.pallas_call(
        kernel,
        out_shape=jax.ShapeDtypeStruct((Mp, Np), out_dtype),
        grid_spec=pltpu.PrefetchScalarGridSpec(
            num_scalar_prefetch=0,
            grid=(Mp // tm, Np // tn, nk),
            in_specs=in_specs,
            out_specs=pl.BlockSpec((tm, tn), lambda i, j, k: (i, j)),
            scratch_shapes=scratch),
        compiler_params=pltpu.CompilerParams(
            dimension_semantics=("parallel", "parallel", "arbitrary"),
            vmem_limit_bytes=48 * 1024 * 1024),
        cost_estimate=cost,
    )(*args)

    if Mp != M:
        out = out[:M]
    # NOTE: no lane crop -- padded channels (zeros) are carried downstream.
    return out.reshape(Nn, Ho, Wo, Np)


def conv2d(x, lyr, *, stride=1, padding=0, dilation=1, relu=False,
           residual=None, out_dtype=jnp.bfloat16):
    return _conv_impl(x, lyr["w"], lyr["scale"], lyr["shift"], residual,
                      kh=lyr["kh"], kw=lyr["kw"], stride=stride, padding=padding,
                      dilation=dilation, relu=relu, out_dtype=out_dtype)


# ----------------------------------------------------------------------------
# MaxPool 3x3 s2 p1 — chained maximum over the 9 taps (XLA-fused, no 9x stack)
# ----------------------------------------------------------------------------
@jax.jit
def maxpool_3x3_s2_p1(x):
    N, H, W, C = x.shape
    Ho = (H + 2 - 3) // 2 + 1
    Wo = (W + 2 - 3) // 2 + 1
    xp = jnp.pad(x, ((0, 0), (1, 1), (1, 1), (0, 0)),
                 constant_values=-jnp.inf)
    out = None
    for i in range(3):
        for j in range(3):
            s = xp[:, i:i + 2 * (Ho - 1) + 1:2, j:j + 2 * (Wo - 1) + 1:2, :]
            out = s if out is None else jnp.maximum(out, s)
    return out


# ----------------------------------------------------------------------------
# Bilinear upsample (align_corners=False) — gather + lerp, channels on lanes
# ----------------------------------------------------------------------------
def _bilinear_coeffs(out_size, in_size):
    i = np.arange(out_size, dtype=np.float64)
    src = (i + 0.5) * (in_size / out_size) - 0.5
    src = np.clip(src, 0.0, in_size - 1)
    i0 = np.floor(src).astype(np.int32)
    i1 = np.minimum(i0 + 1, in_size - 1).astype(np.int32)
    w1 = (src - i0).astype(np.float32)
    w0 = (1.0 - w1).astype(np.float32)
    return i0, i1, w0, w1


@functools.partial(jax.jit, static_argnames=("Ho", "Wo"))
def bilinear_upsample(x, *, Ho, Wo):
    # TODO(synk): resize kept as fused XLA gather+lerp glue (no Pallas kernel);
    #             tiny fraction of total work, channels stay on lanes.
    N, h, w, C = x.shape
    i0h, i1h, w0h, w1h = _bilinear_coeffs(Ho, h)
    i0w, i1w, w0w, w1w = _bilinear_coeffs(Wo, w)
    xf = x.astype(jnp.float32)
    t = (jnp.take(xf, jnp.asarray(i0w), axis=2) * w0w[None, None, :, None]
         + jnp.take(xf, jnp.asarray(i1w), axis=2) * w1w[None, None, :, None])
    out = (jnp.take(t, jnp.asarray(i0h), axis=1) * w0h[None, :, None, None]
           + jnp.take(t, jnp.asarray(i1h), axis=1) * w1h[None, :, None, None])
    return out.astype(jnp.bfloat16)   # compute lerp in f32, store bf16 (HBM traffic)


# ----------------------------------------------------------------------------
# Deterministic synthetic parameters (pre-folded / pre-padded / pre-cast)
# ----------------------------------------------------------------------------
class _KeyGen:
    def __init__(self, key):
        self._key = key
        self._n = 0

    def __call__(self):
        self._n += 1
        return jax.random.fold_in(self._key, self._n)


def _conv_w(kg, kh, kw, cin, cout):
    fan_in = kh * kw * cin
    return (jax.random.normal(kg(), (kh, kw, cin, cout), jnp.float32)
            * np.sqrt(2.0 / fan_in).astype(np.float32))


def _bn_fold(kg, c, eps=1e-5):
    # Eval-mode BatchNorm folded into per-channel scale/shift (in f32).
    gamma = 1.0 + 0.1 * jax.random.normal(kg(), (c,), jnp.float32)
    beta = 0.1 * jax.random.normal(kg(), (c,), jnp.float32)
    mean = 0.1 * jax.random.normal(kg(), (c,), jnp.float32)
    var = 0.5 + jax.random.uniform(kg(), (c,), jnp.float32)
    scale = gamma / jnp.sqrt(var + eps)
    shift = beta - mean * scale
    return scale, shift


def _bias(kg, c):
    return 0.01 * jax.random.normal(kg(), (c,), jnp.float32)


def _prep_conv(w, scale, shift, cin_pad=None):
    """Fold/pad/cast once: weight -> (Kp,Np) bf16, scale/shift -> (1,Np) f32.

    cin_pad lets the weight absorb channel-padded (zero) inputs from the
    previous layer so activations never need a lane crop.
    """
    kh, kw, cin, cout = w.shape
    if cin_pad is None:
        cin_pad = cin
    if cin_pad != cin:
        w = jnp.pad(w, ((0, 0), (0, 0), (0, cin_pad - cin), (0, 0)))
    K = kh * kw * cin_pad
    Kp = _k_pad(K)
    Np = _round_up(cout, 128)
    wmat = jnp.pad(w.reshape(K, cout).astype(jnp.float32),
                   ((0, Kp - K), (0, Np - cout))).astype(jnp.bfloat16)
    sc = jnp.pad(scale.astype(jnp.float32), (0, Np - cout)).reshape(1, Np)
    sh = jnp.pad(shift.astype(jnp.float32), (0, Np - cout)).reshape(1, Np)
    return {"w": wmat, "scale": sc, "shift": sh,
            "kh": kh, "kw": kw, "cout": cout}


def _make_bottleneck(kg, inplanes, planes, stride, dilation, with_ds):
    in_st = _round_up(inplanes, 128)     # stored channels of the block input
    mid_st = _round_up(planes, 128)      # stored channels of conv1/conv2 output
    p = {
        "conv1": _prep_conv(_conv_w(kg, 1, 1, inplanes, planes),
                            *_bn_fold(kg, planes), cin_pad=in_st),
        "conv2": _prep_conv(_conv_w(kg, 3, 3, planes, planes),
                            *_bn_fold(kg, planes), cin_pad=mid_st),
        "conv3": _prep_conv(_conv_w(kg, 1, 1, planes, planes * 4),
                            *_bn_fold(kg, planes * 4), cin_pad=mid_st),
        "stride": stride,
        "dilation": dilation,
    }
    if with_ds:
        p["ds_conv"] = _prep_conv(_conv_w(kg, 1, 1, inplanes, planes * 4),
                                  *_bn_fold(kg, planes * 4), cin_pad=in_st)
        p["ds_stride"] = stride
    return p


def make_params(key):
    kg = _KeyGen(key)
    params = {"stem": _prep_conv(_conv_w(kg, 7, 7, 3, 64), *_bn_fold(kg, 64),
                                 cin_pad=_STEM_CIN_PAD)}
    layers = []
    inplanes, dilation = 64, 1
    # ResNet-50 with replace_stride_with_dilation = [False, True, True]
    for planes, blocks, stride, dilate in [(64, 3, 1, False), (128, 4, 2, False),
                                           (256, 6, 2, True), (512, 3, 2, True)]:
        previous_dilation = dilation
        if dilate:
            dilation *= stride
            stride = 1
        with_ds = (stride != 1) or (inplanes != planes * 4)
        layer = [_make_bottleneck(kg, inplanes, planes, stride,
                                  previous_dilation, with_ds)]
        inplanes = planes * 4
        for _ in range(1, blocks):
            layer.append(_make_bottleneck(kg, inplanes, planes, 1, dilation, False))
        layers.append(layer)
    params["layers"] = layers
    # FCNHead(2048,21): Conv3x3(2048,512,no bias)+BN+ReLU+Dropout+Conv1x1(512,21)
    params["head1"] = _prep_conv(_conv_w(kg, 3, 3, 2048, 512), *_bn_fold(kg, 512),
                                 cin_pad=2048)
    params["head2"] = _prep_conv(_conv_w(kg, 1, 1, 512, 21),
                                 jnp.ones((21,), jnp.float32), _bias(kg, 21),
                                 cin_pad=512)
    # extra nn.Conv2d(21, 7, 3, 1, 1) — its input carries 21 real + 107 zero channels
    params["final"] = _prep_conv(_conv_w(kg, 3, 3, 21, 7),
                                 jnp.ones((7,), jnp.float32), _bias(kg, 7),
                                 cin_pad=_round_up(21, 128))
    return params


# ----------------------------------------------------------------------------
# Forward pass
# ----------------------------------------------------------------------------
def _bottleneck_forward(x, p):
    s, d = p["stride"], p["dilation"]
    out = conv2d(x, p["conv1"], relu=True)
    out = conv2d(out, p["conv2"], stride=s, padding=d, dilation=d, relu=True)
    if "ds_conv" in p:
        identity = conv2d(x, p["ds_conv"], stride=p["ds_stride"])
    else:
        identity = x
    # residual add + ReLU fused into the conv3 matmul epilogue
    return conv2d(out, p["conv3"], relu=True, residual=identity)


def resnet50_fcn_forward(params, x_nchw):
    x = jnp.transpose(x_nchw.astype(jnp.float32), (0, 2, 3, 1))   # NCHW -> NHWC
    H_in, W_in = x.shape[1], x.shape[2]
    cin = x.shape[3]
    if cin < _STEM_CIN_PAD:
        x = jnp.pad(x, ((0, 0), (0, 0), (0, 0), (0, _STEM_CIN_PAD - cin)))
    # stem: 7x7 s2 conv + BN + ReLU + maxpool 3x3 s2 p1
    x = conv2d(x, params["stem"], stride=2, padding=3, relu=True)
    x = maxpool_3x3_s2_p1(x)
    # layer1..layer4 (layer3/4 dilated, output stride 8)
    for layer in params["layers"]:
        for blk in layer:
            x = _bottleneck_forward(x, blk)
    # FCNHead
    x = conv2d(x, params["head1"], stride=1, padding=1, relu=True)
    # TODO(synk): FCNHead Dropout(p=0.1) treated as identity and BatchNorm uses
    #             eval-mode folded running stats (inference semantics).
    x = conv2d(x, params["head2"], stride=1, padding=0)
    # F.interpolate to input size (bilinear, align_corners=False)
    x = bilinear_upsample(x, Ho=H_in, Wo=W_in)
    # extra nn.Conv2d(21, 7, 3, 1, 1)
    x = conv2d(x, params["final"], stride=1, padding=1, out_dtype=jnp.float32)
    x = x[..., :params["final"]["cout"]]     # single lane crop, only on the tiny output
    return jnp.transpose(x, (0, 3, 1, 2))                        # NHWC -> NCHW


if __name__ == "__main__":
    root = jax.random.PRNGKey(0)
    params = make_params(jax.random.fold_in(root, 1))
    x = jax.random.normal(jax.random.fold_in(root, 2), (2, 3, 32, 32), jnp.float32)
    out = resnet50_fcn_forward(params, x)
    out = jax.block_until_ready(out)
    assert out.shape == (2, 7, 32, 32), out.shape
    assert bool(jnp.all(jnp.isfinite(out)))
    print("KERNEL_OK")
</pallas_src>

<mosaic_0001>
module attributes {stable_mosaic.version = 11 : i64} {
  func.func @_mm_bn_act_kernel(%arg0: i32, %arg1: i32, %arg2: i32, %arg3: memref<256x392xbf16, #tpu.memory_space<vmem>>, %arg4: memref<392x128xbf16, #tpu.memory_space<vmem>>, %arg5: memref<1x128xf32, #tpu.memory_space<vmem>>, %arg6: memref<1x128xf32, #tpu.memory_space<vmem>>, %arg7: memref<256x128xbf16, #tpu.memory_space<vmem>>) attributes {dimension_semantics = [#tpu.dimension_semantics<parallel>, #tpu.dimension_semantics<parallel>, #tpu.dimension_semantics<arbitrary>], iteration_bounds = array<i64: 2, 1, 1>, scalar_prefetch = 0 : i64, scratch_operands = 0 : i64, tpu.core_type = #tpu.core_type<tc>, window_params = [{transform_indices = @transform_0, window_bounds = array<i64: 256, 392>}, {transform_indices = @transform_1, window_bounds = array<i64: 392, 128>}, {transform_indices = @transform_2, window_bounds = array<i64: 1, 128>}, {transform_indices = @transform_3, window_bounds = array<i64: 1, 128>}, {transform_indices = @transform_4, window_bounds = array<i64: 256, 128>}]} {
    %c0 = arith.constant 0 : index
    %c0_0 = arith.constant 0 : index
    %0 = vector.load %arg3[%c0, %c0_0] : memref<256x392xbf16, #tpu.memory_space<vmem>>, vector<256x392xbf16>
    %c0_1 = arith.constant 0 : index
    %c0_2 = arith.constant 0 : index
    %1 = vector.load %arg4[%c0_1, %c0_2] : memref<392x128xbf16, #tpu.memory_space<vmem>>, vector<392x128xbf16>
    %cst = arith.constant dense<0.000000e+00> : vector<256x128xf32>
    %2 = tpu.matmul %0, %1, %cst {dimension_numbers = #tpu.dot_dimension_numbers<[1], [0], [0], [1], [0, 0, 1, 1], [], []>} : vector<256x392xbf16>, vector<392x128xbf16>, vector<256x128xf32> -> vector<256x128xf32>
    %c0_3 = arith.constant 0 : index
    %c0_4 = arith.constant 0 : index
    %3 = vector.load %arg5[%c0_3, %c0_4] : memref<1x128xf32, #tpu.memory_space<vmem>>, vector<1x128xf32>
    %4 = vector.broadcast %3 : vector<1x128xf32> to vector<256x128xf32>
    %5 = arith.mulf %2, %4 : vector<256x128xf32>
    %c0_5 = arith.constant 0 : index
    %c0_6 = arith.constant 0 : index
    %6 = vector.load %arg6[%c0_5, %c0_6] : memref<1x128xf32, #tpu.memory_space<vmem>>, vector<1x128xf32>
    %7 = vector.broadcast %6 : vector<1x128xf32> to vector<256x128xf32>
    %8 = arith.addf %5, %7 : vector<256x128xf32>
    %cst_7 = arith.constant 0.000000e+00 : f32
    %9 = vector.broadcast %cst_7 : f32 to vector<256x128xf32>
    %10 = arith.maximumf %8, %9 : vector<256x128xf32>
    %11 = arith.truncf %10 : vector<256x128xf32> to vector<256x128xbf16>
    %c0_8 = arith.constant 0 : index
    %c0_9 = arith.constant 0 : index
    %12 = vector.load %arg7[%c0_8, %c0_9] : memref<256x128xbf16, #tpu.memory_space<vmem>>, vector<256x128xbf16>
    tpu.vector_store %arg7[%c0_8, %c0_9], %11 {strides = array<i32>} : memref<256x128xbf16, #tpu.memory_space<vmem>>, vector<256x128xbf16>,
    return
  }
  func.func @transform_0(%arg0: i32, %arg1: i32, %arg2: i32) -> (i32, i32) {
    %c0_i32 = arith.constant 0 : i32
    return %arg0, %arg2 : i32, i32
  }
  func.func @transform_1(%arg0: i32, %arg1: i32, %arg2: i32) -> (i32, i32) {
    %c0_i32 = arith.constant 0 : i32
    return %arg2, %arg1 : i32, i32
  }
  func.func @transform_2(%arg0: i32, %arg1: i32, %arg2: i32) -> (i32, i32) {
    %c0_i32 = arith.constant 0 : i32
    %c0_i32_0 = arith.constant 0 : i32
    return %c0_i32, %arg1 : i32, i32
  }
  func.func @transform_3(%arg0: i32, %arg1: i32, %arg2: i32) -> (i32, i32) {
    %c0_i32 = arith.constant 0 : i32
    %c0_i32_0 = arith.constant 0 : i32
    return %c0_i32, %arg1 : i32, i32
  }
  func.func @transform_4(%arg0: i32, %arg1: i32, %arg2: i32) -> (i32, i32) {
    %c0_i32 = arith.constant 0 : i32
    return %arg0, %arg1 : i32, i32
  }
}

</mosaic_0001>

<bundles_post_ra>
// kernel: _conv_impl.1
= control target key start
LH: loop header
LB: loop body
LE: loop exit
PB: predicated region body
PF: predicated region fallthrough
CT: control target
= control target key end

     0   :  { %9 = vsyncpa [#allocation3], 0  ;;  %s2732_s0 = inlined_call_operand.vmem [shape: bf16[512,392], index: 0, kind: input, shape index: {}]   ;;  %s2733_s1 = inlined_call_operand.vmem [shape: bf16[392,128], index: 1, kind: input, shape index: {}]   ;;  %s2734_s2 = inlined_call_operand.vmem [shape: f32[1,128], index: 2, kind: input, shape index: {}]   ;;  %s2735_s3 = inlined_call_operand.vmem [shape: f32[1,128], index: 3, kind: input, shape index: {}]   ;;  %s2736_s4 = inlined_call_operand.hbm [shape: bf16[512,128], index: 4, kind: output, shape index: {}]  }
   0x1   :  { %11 = vsyncpa [#allocation3 + $0x1], 0  ;;  %s2318_s15 = smov 0   ;;  %s2320_s16 = smov 0  }
   0x2   :  { %s2322_s17 = smov 0   ;;  %s2324_s18 = smov 0  }
   0x3   :  { %s2326_s19 = smov 0   ;;  %s2328_s20 = smov 0  }
   0x4 LB: > { %s1582_s21 = sadd.s32 4294967295, %s2289_s20   ;;  %s1583_s22 = sadd.s32 4294967294, %s2289_s20   ;;  %s2289_s20 = sphi %s2328_s20, %s17_s20   ;;  %s2285_s19 = sphi %s2326_s19, %s2743_s19   ;;  %s2281_s18 = sphi %s2324_s18, %s2742_s18   ;;  %s2277_s17 = sphi %s2322_s17, %s2741_s17   ;;  %s2273_s16 = sphi %s2320_s16, %s2740_s16   ;;  %s2269_s15 = sphi %s2318_s15, %s2739_s15  }
   0x5   : > { %s36_s23 = sadd.s32 1, %s2285_s19  ;;  %s153_s24 = sadd.s32 1, %s2277_s17 }
   0x6   : > { %p38_p0 = scmp.ge.s32.totalorder %s36_s23, 2  ;;  %p163_p1 = scmp.ne.s32.totalorder %s2277_s17, %s2273_s16 }
   0x7   : > { %p164_p2 = scmp.eq.s32.totalorder %s1582_s21, 1  ;;  %p169_p3 = scmp.ne.s32.totalorder %s2273_s16, %s2269_s15 }
   0x8   : > { %s2745_s23 = smov (%p38_p0, %s36_s23), 0  ;;  %p170_p5 = scmp.eq.s32.totalorder %s1583_s22, 1 }
   0x9   : > { %p2358_p4 = por %p164_p2, %p163_p1  ;;  %s148_s26 = ssub.s32 %s2285_s19, %s2745_s23 }
   0xa   : > { %p1589_p6 = scmp.ge.s32.totalorder %s2289_s20, 1  ;;  %p151_p7 = scmp.eq.s32.totalorder %s148_s26, 0 }
   0xb   : > { %p2365_p8 = por %p170_p5, %p169_p3  ;;  %p227_p9 = scmp.lt.s32.totalorder %s2289_s20, 3 }
   0xc   : > { %s2371_s28 = scalar_select %p151_p7, %s2277_s17, %s153_s24  }
   0xd   : > { %p228_p10 = pnand %p1589_p6, %p227_p9 }
   0xe   : > { %s1591_s9 = sshll.u32 (!%p228_p10), %s2281_s18, 5  ;;  %s2231_s13 = scalar_lea.hbm (!%p228_p10), %s2736_s4, 256 }
   0xf   : > { %231 = sbr.rel (%p228_p10) target bundleno = 450 (0x1c2), region = 36  ;;  %p274_p11 = scmp.lt.s32.totalorder (!%p228_p10), %s1591_s9, 63 }
  0x14   : > { %v2039_v0 = vld [vmem:[%s2733_s1 + $0x38] sm:$0xff]  ;;  %v2038_v3 = vld [vmem:[%s2733_s1 + $0x30] sm:$0xff]  ;;  %s2747_s9 = smov (!%p274_p11, %s1591_s9), 63  ;;  %v2037_v6 = vld [vmem:[%s2733_s1 + $0x28] sm:$0xff]  ;;  %vm914_vm0 = vcmask 1043456   ;;  %vm865_vm1 = vcmask 64512  }
  0x15   : > { %v2047_v1 = vld [vmem:[%s2733_s1 + $0x78] sm:$0xff]  ;;  %918 = vmatpush.bf16.msra.mxu0 %v2039_v0  ;;  %v2046_v4 = vld [vmem:[%s2733_s1 + $0x70] sm:$0xff]  ;;  %s1967_s22 = sshll.u32 %s2747_s9, 4  ;;  %v2045_v7 = vld [vmem:[%s2733_s1 + $0x68] sm:$0xff] }
  0x16   : > { %v2055_v2 = vld [vmem:[%s2733_s1 + $0xb8] sm:$0xff]  ;;  %1007 = vmatpush.bf16.msra.mxu1 %v2047_v1  ;;  %v2054_v5 = vld [vmem:[%s2733_s1 + $0xb0] sm:$0xff]  ;;  %v413_v8 = vld [vmem:[%s2733_s1 + $0xc0] sm:$0xf]  ;;  %s2404_s10 = scalar_lea.vmem %s2732_s0, %s1967_s22  ;;  %s269_s22 = sand.u32 1, %s2273_s16  }
  0x17   : > { %1096 = vmatpush.bf16.msra.mxu2 %v2055_v2  ;;  %v2053_v9 = vld [vmem:[%s2733_s1 + $0xa8] sm:$0xff]  ;;  %v815_v10 = vunpack.c.l.b16 %v413_v8  ;;  %v1606_v12 = vld [vmem:[%s2404_s10 + $0x18] sm:$0xf0]  ;;  %v2036_v14 = vld [vmem:[%s2733_s1 + $0x20] sm:$0xff]  ;;  %s1590_s24 = sshll.u32 %s269_s22, 7 }
  0x18   : > { %v1969_v11 = vld [vmem:[%s2404_s10 + $0xc] sm:$0xf]  ;;  %v2044_v15 = vld [vmem:[%s2733_s1 + $0x60] sm:$0xff]  ;;  %v2035_v19 = vld [vmem:[%s2733_s1 + $0x18] sm:$0xff]  ;;  %s2567_s26 = scalar_lea.vmem [#allocation2], %s1590_s24 }
  0x19   : > { %919 = vmatpush.bf16.msra.mxu0 %v2038_v3  ;;  %v840_v13 = vpack.c.b16 %v815_v10, %v815_v10  ;;  %v2052_v16 = vld [vmem:[%s2733_s1 + $0xa0] sm:$0xff]  ;;  %v1609_v18 = vor.u32 %v1969_v11, %v1606_v12  ;;  %v2043_v20 = vld [vmem:[%s2733_s1 + $0x58] sm:$0xff]  ;;  %v2034_v22 = vld [vmem:[%s2733_s1 + $0x10] sm:$0xff]  ;;  %s1456_s6 = sshll.u32 %s2567_s26, 4  ;;  %s1457_s6 = int_to_ptr.vmem [resolvable:$true] %s1456_s6 }
  0x1a   : > { %1008 = vmatpush.bf16.msra.mxu1 %v2046_v4  ;;  %v2051_v21 = vld [vmem:[%s2733_s1 + $0x98] sm:$0xff]  ;;  %v2042_v23 = vld [vmem:[%s2733_s1 + $0x50] sm:$0xff]  ;;  %v2033_v25 = vld [vmem:[%s2733_s1 + $0x8] sm:$0xff] }
  0x1b   : > { %1097 = vmatpush.bf16.msra.mxu2 %v2054_v5  ;;  %v916_v17 = vsel %vm914_vm0, %v840_v13, 0  ;;  %v2050_v24 = vld [vmem:[%s2733_s1 + $0x90] sm:$0xff]  ;;  %v2041_v26 = vld [vmem:[%s2733_s1 + $0x48] sm:$0xff]  ;;  %v1622_v29 = vld [vmem:[%s2404_s10 + $0x38] sm:$0xf0] }
  0x1c   : > { %1192 = vmatpush.bf16.msra.mxu3 %v916_v17  ;;  %v2049_v27 = vld [vmem:[%s2733_s1 + $0x88] sm:$0xff]  ;;  %v2032_v30 = vld [vmem:[%s2733_s1] sm:$0xff]  ;;  %v1970_v33 = vld [vmem:[%s2404_s10 + $0xc] sm:$0xf0] }
  0x1d   : > { %920 = vmatpush.bf16.msra.mxu0 %v2037_v6  ;;  %v1973_v28 = vld [vmem:[%s2404_s10 + $0x2c] sm:$0xf]  ;;  %v2040_v31 = vld [vmem:[%s2733_s1 + $0x40] sm:$0xff]  ;;  %v1598_v35 = vld [vmem:[%s2404_s10 + $0x10] sm:$0xf0] }
  0x1e   : > { %1009 = vmatpush.bf16.msra.mxu1 %v2045_v7  ;;  %v1596_v32 = vld [vmem:[%s2404_s10] sm:$0xf]  ;;  %v1968_v34 = vld [vmem:[%s2404_s10 + $0x4] sm:$0xf]  ;;  %v1604_v37 = vld [vmem:[%s2404_s10 + $0x8] sm:$0xf]  ;;  %v1625_v39 = vor.u32 %v1973_v28, %v1622_v29 }
  0x1f   : > { %1098 = vmatpush.bf16.msra.mxu2 %v2053_v9  ;;  %1946 = vmatmul.msk.bf16.vlgmr.msra.gmra.mxu3 %vm865_vm1, %v1609_v18  ;;  %v2048_v36 = vld [vmem:[%s2733_s1 + $0x80] sm:$0xff]  ;;  %v1971_v38 = vld [vmem:[%s2404_s10 + $0x14] sm:$0xf0]  ;;  %v1597_v40 = vor.u32 %v1970_v33, %v1596_v32  ;;  %v1601_v41 = vor.u32 %v1968_v34, %v1598_v35  ;;  %v1977_v43 = vld [vmem:[%s2404_s10 + $0x4c] sm:$0xf] }
  0x20   : > { %v1605_v42 = vor.u32 %v1971_v38, %v1604_v37  ;;  %v1638_v44 = vld [vmem:[%s2404_s10 + $0x58] sm:$0xf0]  ;;  %v1612_v45 = vld [vmem:[%s2404_s10 + $0x20] sm:$0xf]  ;;  %v1974_v46 = vld [vmem:[%s2404_s10 + $0x2c] sm:$0xf0] }
  0x21   : > { %921 = vmatpush.bf16.msra.mxu0 %v2036_v14  ;;  %v1972_v47 = vld [vmem:[%s2404_s10 + $0x24] sm:$0xf]  ;;  %v1614_v48 = vld [vmem:[%s2404_s10 + $0x30] sm:$0xf0]  ;;  %v1620_v49 = vld [vmem:[%s2404_s10 + $0x28] sm:$0xf]  ;;  %v1641_v51 = vor.u32 %v1977_v43, %v1638_v44  ;;  %v1613_v52 = vor.u32 %v1974_v46, %v1612_v45 }
  0x22   : > { %1010 = vmatpush.bf16.msra.mxu1 %v2044_v15  ;;  %v1975_v50 = vld [vmem:[%s2404_s10 + $0x34] sm:$0xf0]  ;;  %v1617_v53 = vor.u32 %v1972_v47, %v1614_v48  ;;  %v1981_v55 = vld [vmem:[%s2404_s10 + $0x6c] sm:$0xf]  ;;  %v1654_v56 = vld [vmem:[%s2404_s10 + $0x78] sm:$0xf0] }
  0x23   : > { %1099 = vmatpush.bf16.msra.mxu2 %v2052_v16  ;;  %v1621_v54 = vor.u32 %v1975_v50, %v1620_v49  ;;  %v1628_v57 = vld [vmem:[%s2404_s10 + $0x40] sm:$0xf]  ;;  %v1978_v58 = vld [vmem:[%s2404_s10 + $0x4c] sm:$0xf0]  ;;  %v1976_v59 = vld [vmem:[%s2404_s10 + $0x44] sm:$0xf]  ;;  %v1657_v63 = vor.u32 %v1981_v55, %v1654_v56 }
  0x24   : > { %v1630_v60 = vld [vmem:[%s2404_s10 + $0x50] sm:$0xf0]  ;;  %v1636_v61 = vld [vmem:[%s2404_s10 + $0x48] sm:$0xf]  ;;  %v1979_v62 = vld [vmem:[%s2404_s10 + $0x54] sm:$0xf0]  ;;  %v1629_v0 = vor.u32 %v1978_v58, %v1628_v57 }
  0x25   : > { %922 = vmatpush.bf16.msra.mxu0 %v2035_v19  ;;  %v1633_v1 = vor.u32 %v1976_v59, %v1630_v60  ;;  %v1637_v2 = vor.u32 %v1979_v62, %v1636_v61  ;;  %v1985_v3 = vld [vmem:[%s2404_s10 + $0x8c] sm:$0xf]  ;;  %v1670_v4 = vld [vmem:[%s2404_s10 + $0x98] sm:$0xf0]  ;;  %v1644_v5 = vld [vmem:[%s2404_s10 + $0x60] sm:$0xf] }
  0x26   : > { %1011 = vmatpush.bf16.msra.mxu1 %v2043_v20  ;;  %v1982_v6 = vld [vmem:[%s2404_s10 + $0x6c] sm:$0xf0]  ;;  %v1980_v7 = vld [vmem:[%s2404_s10 + $0x64] sm:$0xf]  ;;  %v1646_v8 = vld [vmem:[%s2404_s10 + $0x70] sm:$0xf0]  ;;  %v1673_v11 = vor.u32 %v1985_v3, %v1670_v4 }
  0x27   : > { %1100 = vmatpush.bf16.msra.mxu2 %v2051_v21  ;;  %v1652_v9 = vld [vmem:[%s2404_s10 + $0x68] sm:$0xf]  ;;  %v1983_v10 = vld [vmem:[%s2404_s10 + $0x74] sm:$0xf0]  ;;  %v1645_v12 = vor.u32 %v1982_v6, %v1644_v5  ;;  %v1649_v13 = vor.u32 %v1980_v7, %v1646_v8  ;;  %v1989_v15 = vld [vmem:[%s2404_s10 + $0xac] sm:$0xf] }
  0x28   : > { %v1653_v14 = vor.u32 %v1983_v10, %v1652_v9  ;;  %v1686_v16 = vld [vmem:[%s2404_s10 + $0xb8] sm:$0xf0]  ;;  %v1660_v17 = vld [vmem:[%s2404_s10 + $0x80] sm:$0xf]  ;;  %v1986_v18 = vld [vmem:[%s2404_s10 + $0x8c] sm:$0xf0] }
  0x29   : > { %923 = vmatpush.bf16.msra.mxu0 %v2034_v22  ;;  %v1984_v19 = vld [vmem:[%s2404_s10 + $0x84] sm:$0xf]  ;;  %v1662_v20 = vld [vmem:[%s2404_s10 + $0x90] sm:$0xf0]  ;;  %v1668_v21 = vld [vmem:[%s2404_s10 + $0x88] sm:$0xf] }
  0x2a   : > { %1012 = vmatpush.bf16.msra.mxu1 %v2042_v23  ;;  %v1987_v22 = vld [vmem:[%s2404_s10 + $0x94] sm:$0xf0]  ;;  %v1689_v23 = vor.u32 %v1989_v15, %v1686_v16  ;;  %v1702_v28 = vld [vmem:[%s2404_s10 + $0xd8] sm:$0xf0]  ;;  %v1676_v29 = vld [vmem:[%s2404_s10 + $0xa0] sm:$0xf] }
  0x2b   : > { %1101 = vmatpush.bf16.msra.mxu2 %v2050_v24  ;;  %v1661_v24 = vor.u32 %v1986_v18, %v1660_v17  ;;  %v1678_v32 = vld [vmem:[%s2404_s10 + $0xb0] sm:$0xf0]  ;;  %v1684_v33 = vld [vmem:[%s2404_s10 + $0xa8] sm:$0xf]  ;;  %v1991_v34 = vld [vmem:[%s2404_s10 + $0xb4] sm:$0xf0] }
  0x2c   : > { %v1685_v38 = vor.u32 %v1991_v34, %v1684_v33  ;;  %v1992_v43 = vld [vmem:[%s2404_s10 + $0xc4] sm:$0xf]  ;;  %v1694_v44 = vld [vmem:[%s2404_s10 + $0xd0] sm:$0xf0]  ;;  %v1700_v45 = vld [vmem:[%s2404_s10 + $0xc8] sm:$0xf] }
  0x2d   : > { %924 = vmatpush.bf16.msra.mxu0 %v2033_v25  ;;  %v1665_v25 = vor.u32 %v1984_v19, %v1662_v20  ;;  %v1995_v46 = vld [vmem:[%s2404_s10 + $0xd4] sm:$0xf0]  ;;  %v1697_v49 = vor.u32 %v1992_v43, %v1694_v44  ;;  %v1996_v55 = vld [vmem:[%s2404_s10 + $0xe4] sm:$0xf]  ;;  %v1710_v56 = vld [vmem:[%s2404_s10 + $0xf0] sm:$0xf0] }
  0x2e   : > { %1013 = vmatpush.bf16.msra.mxu1 %v2041_v26  ;;  %v1669_v26 = vor.u32 %v1987_v22, %v1668_v21  ;;  %v1701_v50 = vor.u32 %v1995_v46, %v1700_v45  ;;  %v1716_v57 = vld [vmem:[%s2404_s10 + $0xe8] sm:$0xf]  ;;  %v1999_v58 = vld [vmem:[%s2404_s10 + $0xf4] sm:$0xf0]  ;;  %v1713_v61 = vor.u32 %v1996_v55, %v1710_v56  ;;  %v2002_v3 = vld [vmem:[%s2404_s10 + $0x10c] sm:$0xf0] }
  0x2f   : > { %1102 = vmatpush.bf16.msra.mxu2 %v2049_v27  ;;  %1947 = vmatmul.msk.bf16.gmra.mxu3 %vm865_vm1, %v1625_v39  ;;  %v1993_v27 = vld [vmem:[%s2404_s10 + $0xcc] sm:$0xf]  ;;  %v1717_v62 = vor.u32 %v1999_v58, %v1716_v57  ;;  %v2000_v4 = vld [vmem:[%s2404_s10 + $0x104] sm:$0xf]  ;;  %v1726_v5 = vld [vmem:[%s2404_s10 + $0x110] sm:$0xf0] }
  0x30   : > { %v1705_v35 = vor.u32 %v1993_v27, %v1702_v28  ;;  %v1997_v39 = vld [vmem:[%s2404_s10 + $0xec] sm:$0xf]  ;;  %v1732_v7 = vld [vmem:[%s2404_s10 + $0x108] sm:$0xf]  ;;  %v2003_v8 = vld [vmem:[%s2404_s10 + $0x114] sm:$0xf0] }
  0x31   : > { %925 = vmatpush.bf16.msra.mxu0 %v2032_v30  ;;  %v1990_v30 = vld [vmem:[%s2404_s10 + $0xac] sm:$0xf0]  ;;  %v2009_v21 = vld [vmem:[%s2404_s10 + $0x14c] sm:$0xf]  ;;  %v1766_v22 = vld [vmem:[%s2404_s10 + $0x158] sm:$0xf0] }
  0x32   : > { %1014 = vmatpush.bf16.msra.mxu1 %v2040_v31  ;;  %v1988_v31 = vld [vmem:[%s2404_s10 + $0xa4] sm:$0xf]  ;;  %v1742_v28 = vld [vmem:[%s2404_s10 + $0x130] sm:$0xf0]  ;;  %v2013_v56 = vld [vmem:[%s2404_s10 + $0x16c] sm:$0xf] }
  0x33   : > { %1103 = vmatpush.bf16.msra.mxu2 %v2048_v36  ;;  %v1677_v36 = vor.u32 %v1990_v30, %v1676_v29  ;;  %v1681_v37 = vor.u32 %v1988_v31, %v1678_v32  ;;  %v2004_v27 = vld [vmem:[%s2404_s10 + $0x124] sm:$0xf]  ;;  %v1748_v30 = vld [vmem:[%s2404_s10 + $0x128] sm:$0xf]  ;;  %v2007_v31 = vld [vmem:[%s2404_s10 + $0x134] sm:$0xf0]  ;;  %v1769_v32 = vor.u32 %v2009_v21, %v1766_v22 }
  0x34   : > { %926 = vmatmul.bf16.vlgmr.msra.gmra.mxu0 %v1597_v40  ;;  %v1718_v40 = vld [vmem:[%s2404_s10 + $0xf8] sm:$0xf0]  ;;  %v1756_v58 = vld [vmem:[%s2404_s10 + $0x140] sm:$0xf] }
  0x35   : > { %1015 = vmatmul.bf16.vlgmr.msra.gmra.mxu1 %v1601_v41  ;;  %v1692_v41 = vld [vmem:[%s2404_s10 + $0xc0] sm:$0xf]  ;;  %v1721_v47 = vor.u32 %v1997_v39, %v1718_v40  ;;  %v1782_v57 = vld [vmem:[%s2404_s10 + $0x178] sm:$0xf0] }
  0x36   : > { %1104 = vmatmul.bf16.vlgmr.msra.gmra.mxu2 %v1605_v42  ;;  %v1994_v42 = vld [vmem:[%s2404_s10 + $0xcc] sm:$0xf0] }
  0x37   : > { %v1693_v48 = vor.u32 %v1994_v42, %v1692_v41  ;;  %v1749_v42 = vor.u32 %v2007_v31, %v1748_v30  ;;  %v2012_v31 = vld [vmem:[%s2404_s10 + $0x164] sm:$0xf] }
  0x3f   : > { %1948 = vmatmul.msk.bf16.gmra.mxu3 %vm865_vm1, %v1641_v51  ;;  %v2001_v51 = vld [vmem:[%s2404_s10 + $0x10c] sm:$0xf] }
  0x44   : > { %931 = vmatmul.bf16.gmra.mxu0 %v1613_v52  ;;  %v1734_v52 = vld [vmem:[%s2404_s10 + $0x118] sm:$0xf0] }
  0x45   : > { %1020 = vmatmul.bf16.gmra.mxu1 %v1617_v53  ;;  %v1708_v53 = vld [vmem:[%s2404_s10 + $0xe0] sm:$0xf]  ;;  %v1737_v59 = vor.u32 %v2001_v51, %v1734_v52 }
  0x46   : > { %1109 = vmatmul.bf16.gmra.mxu2 %v1621_v54  ;;  %v1998_v54 = vld [vmem:[%s2404_s10 + $0xec] sm:$0xf0] }
  0x47   : > { %v1709_v60 = vor.u32 %v1998_v54, %v1708_v53 }
  0x4f   : > { %1949 = vmatmul.msk.bf16.gmra.mxu3 %vm865_vm1, %v1657_v63 }
  0x54   : > { %936 = vmatmul.bf16.gmra.mxu0 %v1629_v0  ;;  %v2005_v0 = vld [vmem:[%s2404_s10 + $0x12c] sm:$0xf] }
  0x55   : > { %1025 = vmatmul.bf16.gmra.mxu1 %v1633_v1  ;;  %v1750_v1 = vld [vmem:[%s2404_s10 + $0x138] sm:$0xf0] }
  0x56   : > { %1114 = vmatmul.bf16.gmra.mxu2 %v1637_v2  ;;  %v1724_v2 = vld [vmem:[%s2404_s10 + $0x100] sm:$0xf]  ;;  %v1753_v9 = vor.u32 %v2005_v0, %v1750_v1  ;;  %v1764_v0 = vld [vmem:[%s2404_s10 + $0x148] sm:$0xf]  ;;  %v2011_v1 = vld [vmem:[%s2404_s10 + $0x154] sm:$0xf0] }
  0x57   : > { %v1725_v10 = vor.u32 %v2002_v3, %v1724_v2  ;;  %v1785_v2 = vor.u32 %v2013_v56, %v1782_v57 }
  0x5f   : > { %1950 = vmatmul.msk.bf16.gmra.mxu3 %vm865_vm1, %v1673_v11  ;;  %v1729_v11 = vor.u32 %v2000_v4, %v1726_v5 }
  0x64   : > { %941 = vmatmul.bf16.gmra.mxu0 %v1645_v12 }
  0x65   : > { %1030 = vmatmul.bf16.gmra.mxu1 %v1649_v13 }
  0x66   : > { %1119 = vmatmul.bf16.gmra.mxu2 %v1653_v14  ;;  %v1733_v14 = vor.u32 %v2003_v8, %v1732_v7 }
  0x6f   : > { %1951 = vmatmul.msk.bf16.gmra.mxu3 %vm865_vm1, %v1689_v23  ;;  %v2543_v23 = vld [vmem:[%s2734_s2] ss:$0 sm:$0xff] }
  0x74   : > { %946 = vmatmul.bf16.gmra.mxu0 %v1661_v24  ;;  %v1740_v24 = vld [vmem:[%s2404_s10 + $0x120] sm:$0xf] }
  0x75   : > { %1035 = vmatmul.bf16.gmra.mxu1 %v1665_v25 }
  0x76   : > { %1124 = vmatmul.bf16.gmra.mxu2 %v1669_v26  ;;  %v2006_v26 = vld [vmem:[%s2404_s10 + $0x12c] sm:$0xf0] }
  0x7f   : > { %1952 = vmatmul.msk.bf16.gmra.mxu3 %vm865_vm1, %v1705_v35  ;;  %v1741_v35 = vor.u32 %v2006_v26, %v1740_v24  ;;  %v2017_v26 = vld [vmem:[%s2404_s10 + $0x18c] sm:$0xf] }
  0x84   : > { %951 = vmatmul.bf16.gmra.mxu0 %v1677_v36  ;;  %v1745_v36 = vor.u32 %v2004_v27, %v1742_v28  ;;  %v1798_v27 = vld [vmem:[%s2404_s10 + $0x198] sm:$0xf0]  ;;  %v1772_v28 = vld [vmem:[%s2404_s10 + $0x160] sm:$0xf] }
  0x85   : > { %1040 = vmatmul.bf16.gmra.mxu1 %v1681_v37 }
  0x86   : > { %1129 = vmatmul.bf16.gmra.mxu2 %v1685_v38  ;;  %v2555_v38 = vld [vmem:[%s2735_s3] ss:$0 sm:$0xff] }
  0x8f   : > { %1953 = vmatmul.msk.bf16.gmra.mxu3 %vm865_vm1, %v1721_v47 }
  0x94   : > { %956 = vmatmul.bf16.gmra.mxu0 %v1693_v48 }
  0x95   : > { %1045 = vmatmul.bf16.gmra.mxu1 %v1697_v49 }
  0x96   : > { %1134 = vmatmul.bf16.gmra.mxu2 %v1701_v50 }
  0x9f   : > { %1954 = vmatmul.msk.bf16.gmra.mxu3 %vm865_vm1, %v1737_v59 }
  0xa2   : > { %v1194_v63 = vpop.f32.mrf.mxu3 }
  0xa4   : > { %961 = vmatmul.bf16.gmra.mxu0 %v1709_v60  ;;  %v2010_v60 = vld [vmem:[%s2404_s10 + $0x14c] sm:$0xf0] }
  0xa5   : > { %1050 = vmatmul.bf16.gmra.mxu1 %v1713_v61  ;;  %v2008_v61 = vld [vmem:[%s2404_s10 + $0x144] sm:$0xf]  ;;  %v1757_v5 = vor.u32 %v2010_v60, %v1756_v58  ;;  %v2021_v60 = vld [vmem:[%s2404_s10 + $0x1ac] sm:$0xf] }
  0xa6   : > { %1139 = vmatmul.bf16.gmra.mxu2 %v1717_v62  ;;  %v1758_v62 = vld [vmem:[%s2404_s10 + $0x150] sm:$0xf0] }
  0xaa   : > { %v1196_v6 = vpop.f32.mrf.mxu3 }
  0xaf   : > { %1955 = vmatmul.msk.bf16.gmra.mxu3 %vm865_vm1, %v1753_v9 }
  0xb1   : > { %v927_v12 = vpop.f32.mrf.mxu0 }
  0xb2   : > { %v1016_v13 = vpop.f32.mrf.mxu1  ;;  %v1199_v16 = vpop.f32.mrf.mxu3 }
  0xb3   : > { %v1017_v15 = vadd.f32 %v1016_v13, %v927_v12 }
  0xb4   : > { %966 = vmatmul.bf16.gmra.mxu0 %v1725_v10 }
  0xb5   : > { %1055 = vmatmul.bf16.gmra.mxu1 %v1729_v11  ;;  %v1765_v11 = vor.u32 %v2011_v1, %v1764_v0  ;;  %v2016_v1 = vld [vmem:[%s2404_s10 + $0x184] sm:$0xf] }
  0xb6   : > { %1144 = vmatmul.bf16.gmra.mxu2 %v1733_v14 }
  0xb9   : > { %v1105_v17 = vpop.f32.mrf.mxu2  ;;  %v929_v19 = vpop.f32.mrf.mxu0 }
  0xba   : > { %v1106_v18 = vadd.f32 %v1105_v17, %v1017_v15  ;;  %v1018_v20 = vpop.f32.mrf.mxu1  ;;  %v1201_v29 = vpop.f32.mrf.mxu3 }
  0xbb   : > { %v1019_v33 = vadd.f32 %v1018_v20, %v929_v19 }
  0xbc   : > { %v1195_v25 = vadd.f32 %v1194_v63, %v1106_v18 }
  0xbe   : > { %v1278_v37 = vmul.f32 %v2543_v23, %v1195_v25 }
  0xbf   : > { %1956 = vmatmul.msk.bf16.gmra.mxu3 %vm865_vm1, %v1769_v32  ;;  %v1774_v32 = vld [vmem:[%s2404_s10 + $0x170] sm:$0xf0] }
  0xc0   : > { %v1314_v44 = vadd.f32 %v2555_v38, %v1278_v37 }
  0xc1   : > { %v1107_v34 = vpop.f32.mrf.mxu2  ;;  %v932_v40 = vpop.f32.mrf.mxu0 }
  0xc2   : > { %v1108_v39 = vadd.f32 %v1107_v34, %v1019_v33  ;;  %v1021_v41 = vpop.f32.mrf.mxu1  ;;  %v1204_v47 = vpop.f32.mrf.mxu3  ;;  %v1346_v50 = vmax.f32 %v1314_v44, 0.0  ;;  %v1780_v34 = vld [vmem:[%s2404_s10 + $0x168] sm:$0xf] }
  0xc3   : > { %v1022_v46 = vadd.f32 %v1021_v41, %v932_v40  ;;  %v1777_v41 = vor.u32 %v2012_v31, %v1774_v32  ;;  %v1830_v31 = vld [vmem:[%s2404_s10 + $0x1d8] sm:$0xf0]  ;;  %v1804_v32 = vld [vmem:[%s2404_s10 + $0x1a0] sm:$0xf] }
  0xc4   : > { %v1197_v43 = vadd.f32 %v1196_v6, %v1108_v39  ;;  %971 = vmatmul.bf16.gmra.mxu0 %v1741_v35  ;;  %v1761_v6 = vor.u32 %v2008_v61, %v1758_v62  ;;  %v2015_v35 = vld [vmem:[%s2404_s10 + $0x174] sm:$0xf0]  ;;  %v1814_v61 = vld [vmem:[%s2404_s10 + $0x1b8] sm:$0xf0]  ;;  %v1788_v62 = vld [vmem:[%s2404_s10 + $0x180] sm:$0xf] }
  0xc5   : > { %1060 = vmatmul.bf16.gmra.mxu1 %v1745_v36  ;;  %v1801_v36 = vor.u32 %v2017_v26, %v1798_v27 }
  0xc6   : > { %v1279_v45 = vmul.f32 %v2543_v23, %v1197_v43  ;;  %1149 = vmatmul.bf16.gmra.mxu2 %v1749_v42 }
  0xc8   : > { %v1315_v48 = vadd.f32 %v2555_v38, %v1279_v45 }
  0xc9   : > { %v1110_v49 = vpop.f32.mrf.mxu2  ;;  %v934_v53 = vpop.f32.mrf.mxu0 }
  0xca   : > { %v1347_v51 = vmax.f32 %v1315_v48, 0.0  ;;  %v1111_v52 = vadd.f32 %v1110_v49, %v1022_v46  ;;  %v1023_v54 = vpop.f32.mrf.mxu1  ;;  %v1206_v63 = vpop.f32.mrf.mxu3  ;;  %v1781_v46 = vor.u32 %v2015_v35, %v1780_v34  ;;  %v2020_v35 = vld [vmem:[%s2404_s10 + $0x1a4] sm:$0xf] }
  0xcb   : > { %v1024_v3 = vadd.f32 %v1023_v54, %v934_v53 }
  0xcc   : > { %v2060_v55 = vpack.c.bf16 %v1347_v51, %v1346_v50  ;;  %v1200_v59 = vadd.f32 %v1199_v16, %v1111_v52 }
  0xce   : > { %2061 = vst [vmem:[%s2567_s26] sm:$0xff] %v2060_v55   ;;  %v1280_v7 = vmul.f32 %v2543_v23, %v1200_v59 }
  0xcf   : > { %1957 = vmatmul.msk.bf16.gmra.mxu3 %vm865_vm1, %v1785_v2  ;;  %v1790_v2 = vld [vmem:[%s2404_s10 + $0x190] sm:$0xf0] }
  0xd0   : > { %v1316_v13 = vadd.f32 %v2555_v38, %v1280_v7 }
  0xd1   : > { %v1112_v4 = vpop.f32.mrf.mxu2  ;;  %v937_v9 = vpop.f32.mrf.mxu0 }
  0xd2   : > { %v1113_v8 = vadd.f32 %v1112_v4, %v1024_v3  ;;  %v1026_v10 = vpop.f32.mrf.mxu1  ;;  %v1209_v16 = vpop.f32.mrf.mxu3  ;;  %v1348_v19 = vmax.f32 %v1316_v13, 0.0  ;;  %v1796_v4 = vld [vmem:[%s2404_s10 + $0x188] sm:$0xf] }
  0xd3   : > { %v1027_v15 = vadd.f32 %v1026_v10, %v937_v9  ;;  %v1793_v10 = vor.u32 %v2016_v1, %v1790_v2  ;;  %v1846_v1 = vld [vmem:[%s2404_s10 + $0x1f8] sm:$0xf0]  ;;  %v1820_v2 = vld [vmem:[%s2404_s10 + $0x1c0] sm:$0xf] }
  0xd4   : > { %v1202_v12 = vadd.f32 %v1201_v29, %v1113_v8  ;;  %976 = vmatmul.bf16.gmra.mxu0 %v1757_v5  ;;  %v2014_v29 = vld [vmem:[%s2404_s10 + $0x16c] sm:$0xf0]  ;;  %v2019_v5 = vld [vmem:[%s2404_s10 + $0x194] sm:$0xf0] }
  0xd5   : > { %1065 = vmatmul.bf16.gmra.mxu1 %v1761_v6  ;;  %v1773_v40 = vor.u32 %v2014_v29, %v1772_v28  ;;  %v1817_v6 = vor.u32 %v2021_v60, %v1814_v61 }
  0xd6   : > { %v1281_v14 = vmul.f32 %v2543_v23, %v1202_v12  ;;  %1154 = vmatmul.bf16.gmra.mxu2 %v1765_v11 }
  0xd8   : > { %v1317_v17 = vadd.f32 %v2555_v38, %v1281_v14 }
  0xd9   : > { %v1115_v18 = vpop.f32.mrf.mxu2  ;;  %v939_v22 = vpop.f32.mrf.mxu0 }
  0xda   : > { %v1349_v20 = vmax.f32 %v1317_v17, 0.0  ;;  %v1116_v21 = vadd.f32 %v1115_v18, %v1027_v15  ;;  %v1028_v24 = vpop.f32.mrf.mxu1  ;;  %v1211_v33 = vpop.f32.mrf.mxu3  ;;  %v1797_v15 = vor.u32 %v2019_v5, %v1796_v4  ;;  %v2024_v5 = vld [vmem:[%s2404_s10 + $0x1c4] sm:$0xf] }
  0xdb   : > { %v1029_v37 = vadd.f32 %v1028_v24, %v939_v22 }
  0xdc   : > { %v2065_v25 = vpack.c.bf16 %v1349_v20, %v1348_v19  ;;  %v1205_v30 = vadd.f32 %v1204_v47, %v1116_v21 }
  0xde   : > { %2137 = vst [vmem:[%s2567_s26 + $0x8] sm:$0xff] %v2065_v25   ;;  %v1282_v42 = vmul.f32 %v2543_v23, %v1205_v30  ;;  %v2025_v30 = vld [vmem:[%s2404_s10 + $0x1cc] sm:$0xf] }
  0xdf   : > { %1958 = vmatmul.msk.bf16.gmra.mxu3 %vm865_vm1, %v1801_v36  ;;  %v1806_v36 = vld [vmem:[%s2404_s10 + $0x1b0] sm:$0xf0] }
  0xe0   : > { %v1318_v47 = vadd.f32 %v2555_v38, %v1282_v42 }
  0xe1   : > { %v1117_v39 = vpop.f32.mrf.mxu2  ;;  %v942_v44 = vpop.f32.mrf.mxu0 }
  0xe2   : > { %v1118_v43 = vadd.f32 %v1117_v39, %v1029_v37  ;;  %v1031_v45 = vpop.f32.mrf.mxu1  ;;  %v1214_v51 = vpop.f32.mrf.mxu3  ;;  %v1350_v54 = vmax.f32 %v1318_v47, 0.0  ;;  %v1812_v39 = vld [vmem:[%s2404_s10 + $0x1a8] sm:$0xf] }
  0xe3   : > { %v1032_v50 = vadd.f32 %v1031_v45, %v942_v44  ;;  %v1809_v45 = vor.u32 %v2020_v35, %v1806_v36  ;;  %v2030_v35 = vld [vmem:[%s2404_s10 + $0x1ec] sm:$0xf0] }
  0xe4   : > { %v1207_v48 = vadd.f32 %v1206_v63, %v1118_v43  ;;  %981 = vmatmul.bf16.gmra.mxu0 %v1773_v40  ;;  %v2018_v63 = vld [vmem:[%s2404_s10 + $0x18c] sm:$0xf0]  ;;  %v2023_v40 = vld [vmem:[%s2404_s10 + $0x1b4] sm:$0xf0] }
  0xe5   : > { %1070 = vmatmul.bf16.gmra.mxu1 %v1777_v41  ;;  %v1789_v9 = vor.u32 %v2018_v63, %v1788_v62  ;;  %v1833_v41 = vor.u32 %v2025_v30, %v1830_v31 }
  0xe6   : > { %v1283_v49 = vmul.f32 %v2543_v23, %v1207_v48  ;;  %1159 = vmatmul.bf16.gmra.mxu2 %v1781_v46 }
  0xe8   : > { %v1319_v52 = vadd.f32 %v2555_v38, %v1283_v49 }
  0xe9   : > { %v1120_v53 = vpop.f32.mrf.mxu2  ;;  %v944_v57 = vpop.f32.mrf.mxu0 }
  0xea   : > { %v1351_v55 = vmax.f32 %v1319_v52, 0.0  ;;  %v1121_v56 = vadd.f32 %v1120_v53, %v1032_v50  ;;  %v1033_v58 = vpop.f32.mrf.mxu1  ;;  %v1216_v3 = vpop.f32.mrf.mxu3  ;;  %v1813_v50 = vor.u32 %v2023_v40, %v1812_v39  ;;  %v1838_v39 = vld [vmem:[%s2404_s10 + $0x1f0] sm:$0xf0] }
  0xeb   : > { %v1034_v7 = vadd.f32 %v1033_v58, %v944_v57 }
  0xec   : > { %v2070_v59 = vpack.c.bf16 %v1351_v55, %v1350_v54  ;;  %v1210_v0 = vadd.f32 %v1209_v16, %v1121_v56 }
  0xee   : > { %2138 = vst [vmem:[%s2567_s26 + $0x10] sm:$0xff] %v2070_v59   ;;  %v1284_v11 = vmul.f32 %v2543_v23, %v1210_v0  ;;  %v2029_v0 = vld [vmem:[%s2404_s10 + $0x1ec] sm:$0xf] }
  0xef   : > { %1959 = vmatmul.msk.bf16.gmra.mxu3 %vm865_vm1, %v1817_v6  ;;  %v1822_v6 = vld [vmem:[%s2404_s10 + $0x1d0] sm:$0xf0] }
  0xf0   : > { %v1320_v16 = vadd.f32 %v2555_v38, %v1284_v11 }
  0xf1   : > { %v1122_v8 = vpop.f32.mrf.mxu2  ;;  %v947_v13 = vpop.f32.mrf.mxu0 }
  0xf2   : > { %v1123_v12 = vadd.f32 %v1122_v8, %v1034_v7  ;;  %v1036_v14 = vpop.f32.mrf.mxu1  ;;  %v1219_v20 = vpop.f32.mrf.mxu3  ;;  %v1352_v24 = vmax.f32 %v1320_v16, 0.0  ;;  %v1828_v8 = vld [vmem:[%s2404_s10 + $0x1c8] sm:$0xf] }
  0xf3   : > { %v1037_v19 = vadd.f32 %v1036_v14, %v947_v13  ;;  %v1825_v14 = vor.u32 %v2024_v5, %v1822_v6 }
  0xf4   : > { %v1212_v17 = vadd.f32 %v1211_v33, %v1123_v12  ;;  %986 = vmatmul.bf16.gmra.mxu0 %v1789_v9  ;;  %v2022_v33 = vld [vmem:[%s2404_s10 + $0x1ac] sm:$0xf0]  ;;  %v2027_v9 = vld [vmem:[%s2404_s10 + $0x1d4] sm:$0xf0] }
  0xf5   : > { %1075 = vmatmul.bf16.gmra.mxu1 %v1793_v10  ;;  %v1805_v44 = vor.u32 %v2022_v33, %v1804_v32  ;;  %v1849_v10 = vor.u32 %v2029_v0, %v1846_v1 }
  0xf6   : > { %v1285_v18 = vmul.f32 %v2543_v23, %v1212_v17  ;;  %1164 = vmatmul.bf16.gmra.mxu2 %v1797_v15 }
  0xf8   : > { %v1321_v21 = vadd.f32 %v2555_v38, %v1285_v18 }
  0xf9   : > { %v1125_v22 = vpop.f32.mrf.mxu2  ;;  %v949_v27 = vpop.f32.mrf.mxu0 }
  0xfa   : > { %v1353_v25 = vmax.f32 %v1321_v21, 0.0  ;;  %v1126_v26 = vadd.f32 %v1125_v22, %v1037_v19  ;;  %v1038_v28 = vpop.f32.mrf.mxu1  ;;  %v1221_v37 = vpop.f32.mrf.mxu3  ;;  %v1829_v19 = vor.u32 %v2027_v9, %v1828_v8 }
  0xfb   : > { %v1039_v42 = vadd.f32 %v1038_v28, %v949_v27 }
  0xfc   : > { %v2075_v29 = vpack.c.bf16 %v1353_v25, %v1352_v24  ;;  %v1215_v34 = vadd.f32 %v1214_v51, %v1126_v26 }
  0xfe   : > { %2139 = vst [vmem:[%s2567_s26 + $0x18] sm:$0xff] %v2075_v29   ;;  %v1286_v46 = vmul.f32 %v2543_v23, %v1215_v34  ;;  %v1836_v34 = vld [vmem:[%s2404_s10 + $0x1e0] sm:$0xf] }
  0xff   : > { %1960 = vmatmul.msk.bf16.gmra.mxu3 %vm865_vm1, %v1833_v41  ;;  %v1844_v41 = vld [vmem:[%s2404_s10 + $0x1e8] sm:$0xf] }
 0x100   : > { %v1322_v51 = vadd.f32 %v2555_v38, %v1286_v46 }
 0x101   : > { %v1127_v43 = vpop.f32.mrf.mxu2  ;;  %v952_v47 = vpop.f32.mrf.mxu0 }
 0x102   : > { %v1128_v48 = vadd.f32 %v1127_v43, %v1039_v42  ;;  %v1041_v49 = vpop.f32.mrf.mxu1  ;;  %v1224_v55 = vpop.f32.mrf.mxu3  ;;  %v1354_v58 = vmax.f32 %v1322_v51, 0.0  ;;  %v2031_v42 = vld [vmem:[%s2404_s10 + $0x1f4] sm:$0xf0] }
 0x103   : > { %v1042_v54 = vadd.f32 %v1041_v49, %v952_v47 }
 0x104   : > { %v1217_v52 = vadd.f32 %v1216_v3, %v1128_v48  ;;  %991 = vmatmul.bf16.gmra.mxu0 %v1805_v44  ;;  %v2026_v3 = vld [vmem:[%s2404_s10 + $0x1cc] sm:$0xf0] }
 0x105   : > { %1080 = vmatmul.bf16.gmra.mxu1 %v1809_v45  ;;  %v1821_v13 = vor.u32 %v2026_v3, %v1820_v2  ;;  %v1837_v45 = vor.u32 %v2030_v35, %v1836_v34 }
 0x106   : > { %v1287_v53 = vmul.f32 %v2543_v23, %v1217_v52  ;;  %1169 = vmatmul.bf16.gmra.mxu2 %v1813_v50  ;;  %v1845_v52 = vor.u32 %v2031_v42, %v1844_v41 }
 0x108   : > { %v1323_v56 = vadd.f32 %v2555_v38, %v1287_v53 }
 0x109   : > { %v1130_v57 = vpop.f32.mrf.mxu2  ;;  %v954_v61 = vpop.f32.mrf.mxu0 }
 0x10a   : > { %v1355_v59 = vmax.f32 %v1323_v56, 0.0  ;;  %v1131_v60 = vadd.f32 %v1130_v57, %v1042_v54  ;;  %v1043_v62 = vpop.f32.mrf.mxu1  ;;  %v1226_v7 = vpop.f32.mrf.mxu3 }
 0x10b   : > { %v1044_v11 = vadd.f32 %v1043_v62, %v954_v61 }
 0x10c   : > { %v2080_v63 = vpack.c.bf16 %v1355_v59, %v1354_v58  ;;  %v1220_v4 = vadd.f32 %v1219_v20, %v1131_v60 }
 0x10e   : > { %2140 = vst [vmem:[%s2567_s26 + $0x20] sm:$0xff] %v2080_v63   ;;  %v1288_v15 = vmul.f32 %v2543_v23, %v1220_v4 }
 0x10f   : > { %1961 = vmatmul.msk.bf16.gmra.mxu3 %vm865_vm1, %v1849_v10 }
 0x110   : > { %v1324_v20 = vadd.f32 %v2555_v38, %v1288_v15 }
 0x111   : > { %v1132_v12 = vpop.f32.mrf.mxu2  ;;  %v957_v16 = vpop.f32.mrf.mxu0 }
 0x112   : > { %v1133_v17 = vadd.f32 %v1132_v12, %v1044_v11  ;;  %v1046_v18 = vpop.f32.mrf.mxu1  ;;  %v1229_v25 = vpop.f32.mrf.mxu3  ;;  %v1356_v28 = vmax.f32 %v1324_v20, 0.0 }
 0x113   : > { %v1047_v24 = vadd.f32 %v1046_v18, %v957_v16 }
 0x114   : > { %v1222_v21 = vadd.f32 %v1221_v37, %v1133_v17  ;;  %996 = vmatmul.bf16.gmra.mxu0 %v1821_v13  ;;  %v2028_v37 = vld [vmem:[%s2404_s10 + $0x1e4] sm:$0xf]  ;;  %s2056_s10 = sshll.u32 %s2281_s18, 7  ;;  %s1443_s18 = scalar_lea.sflag [#allocation3], %s269_s22 }
 0x115   : > { %1085 = vmatmul.bf16.gmra.mxu1 %v1825_v14  ;;  %v1841_v46 = vor.u32 %v2028_v37, %v1838_v39  ;;  %s1455_s5 = scalar_lea.hbm %s2736_s4, %s2056_s10 }
 0x116   : > { %v1289_v22 = vmul.f32 %v2543_v23, %v1222_v21  ;;  %1174 = vmatmul.bf16.gmra.mxu2 %v1829_v19  ;;  %s1458_s7 = sshll.u32 %s1455_s5, 4  ;;  %s1459_s7 = int_to_ptr.hbm [resolvable:$true] %s1458_s7 }
 0x117   : > { %s2225_s8 = sshra.s32 %s1459_s7, 4  ;;  %s2226_s8 = int_to_ptr.hbm [resolvable:$true] %s2225_s8 }
 0x118   : > { %v1325_v26 = vadd.f32 %v2555_v38, %v1289_v22  ;;  %s2227_s9 = scalar_lea.hbm %s2226_s8, 128  ;;  %p2232_p1 = scmp.lt.s32.totalorder %s2226_s8, %s2736_s4 }
 0x119   : > { %v1135_v27 = vpop.f32.mrf.mxu2  ;;  %v959_v31 = vpop.f32.mrf.mxu0  ;;  %p2228_p12 = scmp.ne.s32.totalorder %s2226_s8, %s2227_s9  ;;  %p2233_p2 = scmp.lt.s32.totalorder %s2231_s13, %s2227_s9 }
 0x11a   : > { %v1357_v29 = vmax.f32 %v1325_v26, 0.0  ;;  %v1136_v30 = vadd.f32 %v1135_v27, %v1047_v24  ;;  %v1048_v32 = vpop.f32.mrf.mxu1  ;;  %v1231_v40 = vpop.f32.mrf.mxu3 }
 0x11b   : > { %v1049_v43 = vadd.f32 %v1048_v32, %v959_v31  ;;  %p2229_p13 = pnand %p2228_p12, %p2358_p4  ;;  %p2234_p3 = por %p2233_p2, %p2232_p1 }
 0x11c   : > { %v2085_v33 = vpack.c.bf16 %v1357_v29, %v1356_v28  ;;  %v1225_v36 = vadd.f32 %v1224_v55, %v1136_v30 }
 0x11d   : > { %p2230_p0 = pneg %p2229_p13 }
 0x11e   : > { %2141 = vst [vmem:[%s2567_s26 + $0x28] sm:$0xff] %v2085_v33   ;;  %v1290_v48 = vmul.f32 %v2543_v23, %v1225_v36 }
 0x11f   : > { %p2235_p5 = pnand %p2234_p3, %p2230_p0 }
 0x120   : > { %v1326_v53 = vadd.f32 %v2555_v38, %v1290_v48 }
 0x121   : > { %v1137_v44 = vpop.f32.mrf.mxu2  ;;  %v962_v49 = vpop.f32.mrf.mxu0 }
 0x122   : > { %v1138_v47 = vadd.f32 %v1137_v44, %v1049_v43  ;;  %v1051_v50 = vpop.f32.mrf.mxu1  ;;  %v1234_v56 = vpop.f32.mrf.mxu3  ;;  %v1358_v59 = vmax.f32 %v1326_v53, 0.0 }
 0x123   : > { %v1052_v55 = vadd.f32 %v1051_v50, %v962_v49 }
 0x124   : > { %v1227_v51 = vadd.f32 %v1226_v7, %v1138_v47  ;;  %1001 = vmatmul.bf16.gmra.mxu0 %v1837_v45 }
 0x125   : > { %1090 = vmatmul.bf16.gmra.mxu1 %v1841_v46 }
 0x126   : > { %v1291_v54 = vmul.f32 %v2543_v23, %v1227_v51  ;;  %1179 = vmatmul.bf16.gmra.mxu2 %v1845_v52 }
 0x128   : > { %v1327_v57 = vadd.f32 %v2555_v38, %v1291_v54 }
 0x129   : > { %v1140_v58 = vpop.f32.mrf.mxu2  ;;  %v964_v62 = vpop.f32.mrf.mxu0 }
 0x12a   : > { %v1359_v60 = vmax.f32 %v1327_v57, 0.0  ;;  %v1141_v61 = vadd.f32 %v1140_v58, %v1052_v55  ;;  %v1053_v63 = vpop.f32.mrf.mxu1  ;;  %v1236_v2 = vpop.f32.mrf.mxu3 }
 0x12b   : > { %v1054_v3 = vadd.f32 %v1053_v63, %v964_v62 }
 0x12c   : > { %v2090_v0 = vpack.c.bf16 %v1359_v60, %v1358_v59  ;;  %v1230_v1 = vadd.f32 %v1229_v25, %v1141_v61 }
 0x12e   : > { %2142 = vst [vmem:[%s2567_s26 + $0x30] sm:$0xff] %v2090_v0   ;;  %v1292_v5 = vmul.f32 %v2543_v23, %v1230_v1 }
 0x130   : > { %v1328_v10 = vadd.f32 %v2555_v38, %v1292_v5 }
 0x131   : > { %v1142_v4 = vpop.f32.mrf.mxu2  ;;  %v967_v7 = vpop.f32.mrf.mxu0 }
 0x132   : > { %v1143_v6 = vadd.f32 %v1142_v4, %v1054_v3  ;;  %v1056_v8 = vpop.f32.mrf.mxu1  ;;  %v1239_v13 = vpop.f32.mrf.mxu3  ;;  %v1360_v17 = vmax.f32 %v1328_v10, 0.0 }
 0x133   : > { %v1057_v12 = vadd.f32 %v1056_v8, %v967_v7 }
 0x134   : > { %v1232_v9 = vadd.f32 %v1231_v40, %v1143_v6 }
 0x136   : > { %v1293_v11 = vmul.f32 %v2543_v23, %v1232_v9 }
 0x138   : > { %v1329_v14 = vadd.f32 %v2555_v38, %v1293_v11 }
 0x139   : > { %v1145_v15 = vpop.f32.mrf.mxu2  ;;  %v969_v19 = vpop.f32.mrf.mxu0 }
 0x13a   : > { %v1361_v16 = vmax.f32 %v1329_v14, 0.0  ;;  %v1146_v18 = vadd.f32 %v1145_v15, %v1057_v12  ;;  %v1058_v21 = vpop.f32.mrf.mxu1  ;;  %v1241_v24 = vpop.f32.mrf.mxu3 }
 0x13b   : > { %v1059_v25 = vadd.f32 %v1058_v21, %v969_v19 }
 0x13c   : > { %v2095_v20 = vpack.c.bf16 %v1361_v16, %v1360_v17  ;;  %v1235_v22 = vadd.f32 %v1234_v56, %v1146_v18 }
 0x13e   : > { %2143 = vst [vmem:[%s2567_s26 + $0x38] sm:$0xff] %v2095_v20   ;;  %v1294_v27 = vmul.f32 %v2543_v23, %v1235_v22 }
 0x140   : > { %v1330_v32 = vadd.f32 %v2555_v38, %v1294_v27 }
 0x141   : > { %v1147_v26 = vpop.f32.mrf.mxu2  ;;  %v972_v29 = vpop.f32.mrf.mxu0 }
 0x142   : > { %v1148_v28 = vadd.f32 %v1147_v26, %v1059_v25  ;;  %v1061_v30 = vpop.f32.mrf.mxu1  ;;  %v1244_v35 = vpop.f32.mrf.mxu3  ;;  %v1362_v39 = vmax.f32 %v1330_v32, 0.0 }
 0x143   : > { %v1062_v34 = vadd.f32 %v1061_v30, %v972_v29 }
 0x144   : > { %v1237_v31 = vadd.f32 %v1236_v2, %v1148_v28 }
 0x146   : > { %v1295_v33 = vmul.f32 %v2543_v23, %v1237_v31 }
 0x148   : > { %v1331_v36 = vadd.f32 %v2555_v38, %v1295_v33 }
 0x149   : > { %v1150_v37 = vpop.f32.mrf.mxu2  ;;  %v974_v42 = vpop.f32.mrf.mxu0 }
 0x14a   : > { %v1363_v40 = vmax.f32 %v1331_v36, 0.0  ;;  %v1151_v41 = vadd.f32 %v1150_v37, %v1062_v34  ;;  %v1063_v43 = vpop.f32.mrf.mxu1  ;;  %v1246_v46 = vpop.f32.mrf.mxu3 }
 0x14b   : > { %v1064_v48 = vadd.f32 %v1063_v43, %v974_v42 }
 0x14c   : > { %v2100_v44 = vpack.c.bf16 %v1363_v40, %v1362_v39  ;;  %v1240_v45 = vadd.f32 %v1239_v13, %v1151_v41 }
 0x14e   : > { %2144 = vst [vmem:[%s2567_s26 + $0x40] sm:$0xff] %v2100_v44   ;;  %v1296_v49 = vmul.f32 %v2543_v23, %v1240_v45 }
 0x150   : > { %v1332_v54 = vadd.f32 %v2555_v38, %v1296_v49 }
 0x151   : > { %v1152_v47 = vpop.f32.mrf.mxu2  ;;  %v977_v52 = vpop.f32.mrf.mxu0 }
 0x152   : > { %v1153_v50 = vadd.f32 %v1152_v47, %v1064_v48  ;;  %v1066_v51 = vpop.f32.mrf.mxu1  ;;  %v1249_v59 = vpop.f32.mrf.mxu3  ;;  %v1364_v60 = vmax.f32 %v1332_v54, 0.0 }
 0x153   : > { %v1067_v56 = vadd.f32 %v1066_v51, %v977_v52 }
 0x154   : > { %v1242_v53 = vadd.f32 %v1241_v24, %v1153_v50 }
 0x156   : > { %v1297_v55 = vmul.f32 %v2543_v23, %v1242_v53 }
 0x158   : > { %v1333_v57 = vadd.f32 %v2555_v38, %v1297_v55 }
 0x159   : > { %v1155_v58 = vpop.f32.mrf.mxu2  ;;  %v979_v63 = vpop.f32.mrf.mxu0 }
 0x15a   : > { %v1365_v61 = vmax.f32 %v1333_v57, 0.0  ;;  %v1156_v62 = vadd.f32 %v1155_v58, %v1067_v56  ;;  %v1068_v0 = vpop.f32.mrf.mxu1  ;;  %v1251_v9 = vpop.f32.mrf.mxu3 }
 0x15b   : > { %v1069_v3 = vadd.f32 %v1068_v0, %v979_v63 }
 0x15c   : > { %v2105_v1 = vpack.c.bf16 %v1365_v61, %v1364_v60  ;;  %v1245_v2 = vadd.f32 %v1244_v35, %v1156_v62 }
 0x15e   : > { %2145 = vst [vmem:[%s2567_s26 + $0x48] sm:$0xff] %v2105_v1   ;;  %v1298_v5 = vmul.f32 %v2543_v23, %v1245_v2 }
 0x160   : > { %v1334_v11 = vadd.f32 %v2555_v38, %v1298_v5 }
 0x161   : > { %v1157_v4 = vpop.f32.mrf.mxu2  ;;  %v982_v7 = vpop.f32.mrf.mxu0 }
 0x162   : > { %v1158_v6 = vadd.f32 %v1157_v4, %v1069_v3  ;;  %v1071_v8 = vpop.f32.mrf.mxu1  ;;  %v1366_v17 = vmax.f32 %v1334_v11, 0.0  ;;  %v1254_v22 = vpop.f32.mrf.mxu3 }
 0x163   : > { %v1072_v13 = vadd.f32 %v1071_v8, %v982_v7 }
 0x164   : > { %v1247_v10 = vadd.f32 %v1246_v46, %v1158_v6 }
 0x166   : > { %v1299_v12 = vmul.f32 %v2543_v23, %v1247_v10 }
 0x168   : > { %v1335_v14 = vadd.f32 %v2555_v38, %v1299_v12 }
 0x169   : > { %v1160_v15 = vpop.f32.mrf.mxu2  ;;  %v984_v19 = vpop.f32.mrf.mxu0 }
 0x16a   : > { %v1367_v16 = vmax.f32 %v1335_v14, 0.0  ;;  %v1161_v18 = vadd.f32 %v1160_v15, %v1072_v13  ;;  %v1073_v21 = vpop.f32.mrf.mxu1  ;;  %v1256_v35 = vpop.f32.mrf.mxu3 }
 0x16b   : > { %v1074_v25 = vadd.f32 %v1073_v21, %v984_v19 }
 0x16c   : > { %v2110_v20 = vpack.c.bf16 %v1367_v16, %v1366_v17  ;;  %v1250_v24 = vadd.f32 %v1249_v59, %v1161_v18 }
 0x16e   : > { %2146 = vst [vmem:[%s2567_s26 + $0x50] sm:$0xff] %v2110_v20   ;;  %v1300_v27 = vmul.f32 %v2543_v23, %v1250_v24 }
 0x170   : > { %v1336_v32 = vadd.f32 %v2555_v38, %v1300_v27 }
 0x171   : > { %v1162_v26 = vpop.f32.mrf.mxu2  ;;  %v987_v29 = vpop.f32.mrf.mxu0 }
 0x172   : > { %v1163_v28 = vadd.f32 %v1162_v26, %v1074_v25  ;;  %v1076_v30 = vpop.f32.mrf.mxu1  ;;  %v1368_v39 = vmax.f32 %v1336_v32, 0.0  ;;  %v1259_v47 = vpop.f32.mrf.mxu3 }
 0x173   : > { %v1077_v34 = vadd.f32 %v1076_v30, %v987_v29 }
 0x174   : > { %v1252_v31 = vadd.f32 %v1251_v9, %v1163_v28 }
 0x176   : > { %v1301_v33 = vmul.f32 %v2543_v23, %v1252_v31 }
 0x178   : > { %v1337_v36 = vadd.f32 %v2555_v38, %v1301_v33 }
 0x179   : > { %v1165_v37 = vpop.f32.mrf.mxu2  ;;  %v989_v42 = vpop.f32.mrf.mxu0 }
 0x17a   : > { %v1369_v40 = vmax.f32 %v1337_v36, 0.0  ;;  %v1166_v41 = vadd.f32 %v1165_v37, %v1077_v34  ;;  %v1078_v43 = vpop.f32.mrf.mxu1  ;;  %v1261_v0 = vpop.f32.mrf.mxu3 }
 0x17b   : > { %v1079_v46 = vadd.f32 %v1078_v43, %v989_v42 }
 0x17c   : > { %v2115_v44 = vpack.c.bf16 %v1369_v40, %v1368_v39  ;;  %v1255_v45 = vadd.f32 %v1254_v22, %v1166_v41 }
 0x17e   : > { %2147 = vst [vmem:[%s2567_s26 + $0x58] sm:$0xff] %v2115_v44   ;;  %v1302_v49 = vmul.f32 %v2543_v23, %v1255_v45 }
 0x180   : > { %v1338_v54 = vadd.f32 %v2555_v38, %v1302_v49 }
 0x181   : > { %v1167_v48 = vpop.f32.mrf.mxu2  ;;  %v992_v52 = vpop.f32.mrf.mxu0 }
 0x182   : > { %v1168_v50 = vadd.f32 %v1167_v48, %v1079_v46  ;;  %v1081_v51 = vpop.f32.mrf.mxu1  ;;  %v1370_v59 = vmax.f32 %v1338_v54, 0.0  ;;  %v1264_v10 = vpop.f32.mrf.mxu3 }
 0x183   : > { %v1082_v56 = vadd.f32 %v1081_v51, %v992_v52 }
 0x184   : > { %v1257_v53 = vadd.f32 %v1256_v35, %v1168_v50 }
 0x186   : > { %v1303_v55 = vmul.f32 %v2543_v23, %v1257_v53 }
 0x188   : > { %v1339_v57 = vadd.f32 %v2555_v38, %v1303_v55 }
 0x189   : > { %v1170_v58 = vpop.f32.mrf.mxu2  ;;  %v994_v62 = vpop.f32.mrf.mxu0 }
 0x18a   : > { %v1371_v60 = vmax.f32 %v1339_v57, 0.0  ;;  %v1171_v61 = vadd.f32 %v1170_v58, %v1082_v56  ;;  %v1083_v63 = vpop.f32.mrf.mxu1  ;;  %v1266_v24 = vpop.f32.mrf.mxu3 }
 0x18b   : > { %v1084_v3 = vadd.f32 %v1083_v63, %v994_v62 }
 0x18c   : > { %v2120_v1 = vpack.c.bf16 %v1371_v60, %v1370_v59  ;;  %v1260_v2 = vadd.f32 %v1259_v47, %v1171_v61 }
 0x18e   : > { %2148 = vst [vmem:[%s2567_s26 + $0x60] sm:$0xff] %v2120_v1   ;;  %v1304_v5 = vmul.f32 %v2543_v23, %v1260_v2 }
 0x190   : > { %v1340_v11 = vadd.f32 %v2555_v38, %v1304_v5 }
 0x191   : > { %v1172_v4 = vpop.f32.mrf.mxu2  ;;  %v997_v7 = vpop.f32.mrf.mxu0 }
 0x192   : > { %v1173_v6 = vadd.f32 %v1172_v4, %v1084_v3  ;;  %v1086_v8 = vpop.f32.mrf.mxu1  ;;  %v1372_v17 = vmax.f32 %v1340_v11, 0.0  ;;  %v1269_v36 = vpop.f32.mrf.mxu3 }
 0x193   : > { %v1087_v13 = vadd.f32 %v1086_v8, %v997_v7 }
 0x194   : > { %v1262_v9 = vadd.f32 %v1261_v0, %v1173_v6 }
 0x196   : > { %v1305_v12 = vmul.f32 %v2543_v23, %v1262_v9 }
 0x198   : > { %v1341_v14 = vadd.f32 %v2555_v38, %v1305_v12 }
 0x199   : > { %v1175_v15 = vpop.f32.mrf.mxu2  ;;  %v999_v19 = vpop.f32.mrf.mxu0 }
 0x19a   : > { %v1373_v16 = vmax.f32 %v1341_v14, 0.0  ;;  %v1176_v18 = vadd.f32 %v1175_v15, %v1087_v13  ;;  %v1088_v21 = vpop.f32.mrf.mxu1  ;;  %v1271_v50 = vpop.f32.mrf.mxu3 }
 0x19b   : > { %v1089_v25 = vadd.f32 %v1088_v21, %v999_v19 }
 0x19c   : > { %v2125_v20 = vpack.c.bf16 %v1373_v16, %v1372_v17  ;;  %v1265_v22 = vadd.f32 %v1264_v10, %v1176_v18 }
 0x19e   : > { %2149 = vst [vmem:[%s2567_s26 + $0x68] sm:$0xff] %v2125_v20   ;;  %v1306_v27 = vmul.f32 %v2543_v23, %v1265_v22 }
 0x1a0   : > { %v1342_v32 = vadd.f32 %v2555_v38, %v1306_v27 }
 0x1a1   : > { %v1177_v26 = vpop.f32.mrf.mxu2  ;;  %v1002_v29 = vpop.f32.mrf.mxu0 }
 0x1a2   : > { %v1178_v28 = vadd.f32 %v1177_v26, %v1089_v25  ;;  %v1091_v30 = vpop.f32.mrf.mxu1  ;;  %v1374_v39 = vmax.f32 %v1342_v32, 0.0 }
 0x1a3   : > { %v1092_v34 = vadd.f32 %v1091_v30, %v1002_v29 }
 0x1a4   : > { %v1267_v31 = vadd.f32 %v1266_v24, %v1178_v28 }
 0x1a6   : > { %v1307_v33 = vmul.f32 %v2543_v23, %v1267_v31 }
 0x1a8   : > { %v1343_v35 = vadd.f32 %v2555_v38, %v1307_v33 }
 0x1a9   : > { %v1180_v37 = vpop.f32.mrf.mxu2  ;;  %v1004_v43 = vpop.f32.mrf.mxu0 }
 0x1aa   : > { %v1375_v40 = vmax.f32 %v1343_v35, 0.0  ;;  %v1181_v41 = vadd.f32 %v1180_v37, %v1092_v34  ;;  %v1093_v44 = vpop.f32.mrf.mxu1 }
 0x1ab   : > { %v1094_v46 = vadd.f32 %v1093_v44, %v1004_v43 }
 0x1ac   : > { %v2130_v42 = vpack.c.bf16 %v1375_v40, %v1374_v39  ;;  %v1270_v45 = vadd.f32 %v1269_v36, %v1181_v41 }
 0x1ae   : > { %2150 = vst [vmem:[%s2567_s26 + $0x70] sm:$0xff] %v2130_v42   ;;  %v1308_v47 = vmul.f32 %v2543_v23, %v1270_v45 }
 0x1b0   : > { %v1344_v51 = vadd.f32 %v2555_v38, %v1308_v47 }
 0x1b1   : > { %v1182_v48 = vpop.f32.mrf.mxu2 }
 0x1b2   : > { %v1183_v49 = vadd.f32 %v1182_v48, %v1094_v46  ;;  %v1376_v55 = vmax.f32 %v1344_v51, 0.0 }
 0x1b4   : > { %v1272_v52 = vadd.f32 %v1271_v50, %v1183_v49 }
 0x1b6   : > { %v1309_v53 = vmul.f32 %v2543_v23, %v1272_v52 }
 0x1b8   : > { %v1345_v54 = vadd.f32 %v2555_v38, %v1309_v53 }
 0x1ba   : > { %v1377_v56 = vmax.f32 %v1345_v54, 0.0 }
 0x1bc   : > { %v2135_v57 = vpack.c.bf16 %v1377_v56, %v1376_v55 }
 0x1be   : > { %2151 = vst [vmem:[%s2567_s26 + $0x78] sm:$0xff] %v2135_v57  }
 0x1bf   : > { %2238 = shalt.err (!%p2235_p5)
}
 0x1c0   : > { %s2291_s22 = smov 64   ;;  %s2292_s24 = smov 4  }
 0x1c1   : > { %2152 = dma.vmem_to_hbm [thread:$0]  (%p2358_p4), %s1457_s6, 2048, %s1459_s7, %s1443_s18, %s2291_s22, %s2291_s22, %s2292_s24  }
 0x1c2 PF: > { %p2158_p6 = scmp.ge.s32.totalorder %s2289_s20, 2  ;;  %s1473_s26 = sand.u32 1, %s2269_s15  }
 0x1c3   : > { %s1474_s10 = scalar_lea.sflag [#allocation3], %s1473_s26 }
 0x1c4   : > { %p2155_p7 = pnand %p2158_p6, %p2365_p8 }
 0x1c6   : > { %p2156_p9 = pneg %p2155_p7 }
 0x1c8   : > { %2264 = dma.done.wait (%p2156_p9), %s1474_s10, 2048  }
 0x1c9   : > { %2266 = vsyncadd (%p2156_p9), %s1474_s10, 4294965248  ;;  %s17_s20 = sadd.s32 1, %s2289_s20   ;;  %s2739_s15 = smov %s2273_s16 }
 0x1ca   : > { %p14_p10 = scmp.ge.s32.totalorder %s17_s20, 4   ;;  %s2740_s16 = smov %s2277_s17 }
 0x1cb   : > { %s2741_s17 = smov %s2371_s28  ;;  %s2742_s18 = smov %s2285_s19 }
 0x1cc   : > { %s2743_s19 = smov %s2745_s23  ;;  %16 = sbr.rel (!%p14_p10) target bundleno = 4 (0x4), region = 80 }
 0x1d1   :  { %1480 = vsyncpa [#allocation3], 1 }
 0x1d2   :  { %1482 = vsyncpa [#allocation3 + $0x1], 1 }

</bundles_post_ra>
